<compile_context>
chip_gen: v7x
topology: tpu7x:2x2x1
jax: 0.10.0
libtpu: 0.0.40
codegen_flags: <defaults>
</compile_context>

<pallas_src>
import jax
import jax.numpy as jnp
from jax.experimental import pallas as pl
from jax.experimental.pallas import tpu as pltpu

_LANE = 128
_SUBLANE = 8


def _adv_classify_kernel(x_ref, w1_ref, b1_ref, w2_ref, b2_ref, o_ref):
    # fc1 + tanh  (f32 accumulation on the MXU)
    h = jnp.tanh(
        jnp.dot(x_ref[...], w1_ref[...], preferred_element_type=jnp.float32)
        + b1_ref[...]
    )
    # fc2
    logits = (
        jnp.dot(h, w2_ref[...], preferred_element_type=jnp.float32) + b2_ref[...]
    )
    # numerically stable log_softmax over the (lane-dense, padded) class axis;
    # padded classes carry a -1e30 bias so exp() underflows to 0 for them.
    m = jnp.max(logits, axis=-1, keepdims=True)
    shifted = logits - m
    lse = jnp.log(jnp.sum(jnp.exp(shifted), axis=-1, keepdims=True))
    o_ref[...] = (shifted - lse).astype(o_ref.dtype)


def _round_up(n, m):
    return ((n + m - 1) // m) * m


def city_adversarial_classify_forward(x, w1, b1, w2, b2,
                                      constant=1.0, reverse=True,
                                      block_b=512):
    """x: (B, encode_dim) f32.  constant/reverse only affect backward; the
    forward pass is identity through Grad / GradReverse."""
    del constant, reverse  # forward is identity through the grad layers

    B, D = x.shape
    H = w1.shape[1]           # 16
    C = w2.shape[1]           # num_class

    # Pad every minor dim up to a lane-width multiple (>= 128) so the MXU gets
    # full tiles and the output store is unmasked / lane-dense.
    Dp = _round_up(max(D, _LANE), _LANE)
    Hp = _round_up(max(H, _LANE), _LANE)
    Cp = _round_up(max(C, _LANE), _LANE)

    # Batch tile: 256-1024 rows is the sweet spot; shrink for tiny batches.
    TB = block_b
    if B <= TB:
        TB = _round_up(max(B, _SUBLANE), _SUBLANE)
    Bp = _round_up(B, TB)

    f32 = jnp.float32
    xp = jnp.zeros((Bp, Dp), f32).at[:B, :D].set(x.astype(f32))
    w1p = jnp.zeros((Dp, Hp), f32).at[:D, :H].set(w1.astype(f32))
    b1p = jnp.zeros((1, Hp), f32).at[0, :H].set(b1.astype(f32))
    w2p = jnp.zeros((Hp, Cp), f32).at[:H, :C].set(w2.astype(f32))
    # padded class slots get a huge negative bias -> exp() == 0 under softmax
    b2p = jnp.full((1, Cp), -1e30, f32).at[0, :C].set(b2.astype(f32))

    grid = (pl.cdiv(Bp, TB),)

    cost = pl.CostEstimate(
        flops=2 * Bp * (Dp * Hp + Hp * Cp),
        transcendentals=Bp * (Hp + Cp),
        bytes_accessed=4 * (Bp * Dp + Bp * Cp + Dp * Hp + Hp * Cp + Hp + Cp),
    )

    vmem = pltpu.MemorySpace.VMEM
    out_padded = pl.pallas_call(
        _adv_classify_kernel,
        out_shape=jax.ShapeDtypeStruct((Bp, Cp), f32),
        grid=grid,
        in_specs=[
            # x: tiled along the batch axis
            pl.BlockSpec((TB, Dp), lambda i: (i, 0), memory_space=vmem),
            # weights / biases: constant block index -> VMEM resident
            pl.BlockSpec((Dp, Hp), lambda i: (0, 0), memory_space=vmem),
            pl.BlockSpec((1, Hp), lambda i: (0, 0), memory_space=vmem),
            pl.BlockSpec((Hp, Cp), lambda i: (0, 0), memory_space=vmem),
            pl.BlockSpec((1, Cp), lambda i: (0, 0), memory_space=vmem),
        ],
        out_specs=pl.BlockSpec((TB, Cp), lambda i: (i, 0), memory_space=vmem),
        compiler_params=pltpu.CompilerParams(
            dimension_semantics=("parallel",),
        ),
        cost_estimate=cost,
    )(xp, w1p, b1p, w2p, b2p)

    return out_padded[:B, :C]


def _reference(x, w1, b1, w2, b2):
    h = jnp.tanh(x @ w1 + b1)
    return jax.nn.log_softmax(h @ w2 + b2, axis=1)


if __name__ == "__main__":
    # Module hyperparams (small, consistent with the nn.Module __init__).
    num_class = 4
    encode_dim = 32
    batch = 8

    key = jax.random.PRNGKey(0)
    k_x, k_w1, k_b1, k_w2, k_b2, k_x2 = jax.random.split(key, 6)

    x = jax.random.normal(k_x, (batch, encode_dim), dtype=jnp.float32)

    # Deterministic parameter init (uniform, nn.Linear-like scale), stored
    # already transposed: (in_features, out_features).
    lim1 = 1.0 / (encode_dim ** 0.5)
    w1 = jax.random.uniform(k_w1, (encode_dim, 16), jnp.float32, -lim1, lim1)
    b1 = jax.random.uniform(k_b1, (16,), jnp.float32, -lim1, lim1)
    lim2 = 1.0 / (16 ** 0.5)
    w2 = jax.random.uniform(k_w2, (16, num_class), jnp.float32, -lim2, lim2)
    b2 = jax.random.uniform(k_b2, (num_class,), jnp.float32, -lim2, lim2)

    # Small-shape run (single grid step).
    out = city_adversarial_classify_forward(x, w1, b1, w2, b2,
                                            constant=0.5, reverse=True)
    out = jax.block_until_ready(out)
    ref = _reference(x, w1, b1, w2, b2)
    assert out.shape == (batch, num_class)
    assert jnp.allclose(out, ref, atol=1e-5), "mismatch vs reference (small)"

    # Multi-tile run to exercise the batch-tiled grid path (+ row padding).
    batch2 = 300
    x2 = jax.random.normal(k_x2, (batch2, encode_dim), dtype=jnp.float32)
    out2 = city_adversarial_classify_forward(x2, w1, b1, w2, b2,
                                             constant=0.5, reverse=False,
                                             block_b=128)
    out2 = jax.block_until_ready(out2)
    ref2 = _reference(x2, w1, b1, w2, b2)
    assert out2.shape == (batch2, num_class)
    assert jnp.allclose(out2, ref2, atol=1e-5), "mismatch vs reference (tiled)"

    print("KERNEL_OK")
</pallas_src>

<mosaic_0001>
module attributes {stable_mosaic.version = 11 : i64} {
  func.func @_adv_classify_kernel(%arg0: i32, %arg1: memref<8x128xf32, #tpu.memory_space<vmem>>, %arg2: memref<128x128xf32, #tpu.memory_space<vmem>>, %arg3: memref<1x128xf32, #tpu.memory_space<vmem>>, %arg4: memref<128x128xf32, #tpu.memory_space<vmem>>, %arg5: memref<1x128xf32, #tpu.memory_space<vmem>>, %arg6: memref<8x128xf32, #tpu.memory_space<vmem>>) attributes {dimension_semantics = [#tpu.dimension_semantics<parallel>], iteration_bounds = array<i64: 1>, scalar_prefetch = 0 : i64, scratch_operands = 0 : i64, tpu.core_type = #tpu.core_type<tc>, window_params = [{transform_indices = @transform_0, window_bounds = array<i64: 8, 128>}, {pipeline_mode = #tpu.pipeline_mode<synchronous>, transform_indices = @transform_1, window_bounds = array<i64: 128, 128>}, {pipeline_mode = #tpu.pipeline_mode<synchronous>, transform_indices = @transform_2, window_bounds = array<i64: 1, 128>}, {pipeline_mode = #tpu.pipeline_mode<synchronous>, transform_indices = @transform_3, window_bounds = array<i64: 128, 128>}, {pipeline_mode = #tpu.pipeline_mode<synchronous>, transform_indices = @transform_4, window_bounds = array<i64: 1, 128>}, {transform_indices = @transform_5, window_bounds = array<i64: 8, 128>}]} {
    %c0 = arith.constant 0 : index
    %c0_0 = arith.constant 0 : index
    %0 = vector.load %arg1[%c0, %c0_0] : memref<8x128xf32, #tpu.memory_space<vmem>>, vector<8x128xf32>
    %c0_1 = arith.constant 0 : index
    %c0_2 = arith.constant 0 : index
    %1 = vector.load %arg2[%c0_1, %c0_2] : memref<128x128xf32, #tpu.memory_space<vmem>>, vector<128x128xf32>
    %cst = arith.constant dense<0.000000e+00> : vector<8x128xf32>
    %2 = tpu.matmul %0, %1, %cst {dimension_numbers = #tpu.dot_dimension_numbers<[1], [0], [0], [1], [0, 0, 1, 1], [], []>} : vector<8x128xf32>, vector<128x128xf32>, vector<8x128xf32> -> vector<8x128xf32>
    %c0_3 = arith.constant 0 : index
    %c0_4 = arith.constant 0 : index
    %3 = vector.load %arg3[%c0_3, %c0_4] : memref<1x128xf32, #tpu.memory_space<vmem>>, vector<1x128xf32>
    %4 = vector.broadcast %3 : vector<1x128xf32> to vector<8x128xf32>
    %5 = arith.addf %2, %4 : vector<8x128xf32>
    %6 = math.tanh %5 : vector<8x128xf32>
    %c0_5 = arith.constant 0 : index
    %c0_6 = arith.constant 0 : index
    %7 = vector.load %arg4[%c0_5, %c0_6] : memref<128x128xf32, #tpu.memory_space<vmem>>, vector<128x128xf32>
    %cst_7 = arith.constant dense<0.000000e+00> : vector<8x128xf32>
    %8 = tpu.matmul %6, %7, %cst_7 {dimension_numbers = #tpu.dot_dimension_numbers<[1], [0], [0], [1], [0, 0, 1, 1], [], []>} : vector<8x128xf32>, vector<128x128xf32>, vector<8x128xf32> -> vector<8x128xf32>
    %c0_8 = arith.constant 0 : index
    %c0_9 = arith.constant 0 : index
    %9 = vector.load %arg5[%c0_8, %c0_9] : memref<1x128xf32, #tpu.memory_space<vmem>>, vector<1x128xf32>
    %10 = vector.broadcast %9 : vector<1x128xf32> to vector<8x128xf32>
    %11 = arith.addf %8, %10 : vector<8x128xf32>
    %cst_10 = arith.constant dense<0xFF800000> : vector<8xf32>
    %12 = vector.multi_reduction <maximumf>, %11, %cst_10 [1] : vector<8x128xf32> to vector<8xf32>
    %13 = vector.shape_cast %12 : vector<8xf32> to vector<8x1xf32>
    %14 = vector.broadcast %13 : vector<8x1xf32> to vector<8x128xf32>
    %15 = arith.subf %11, %14 : vector<8x128xf32>
    %16 = math.exp %15 : vector<8x128xf32>
    %cst_11 = arith.constant dense<0.000000e+00> : vector<8xf32>
    %17 = vector.multi_reduction <add>, %16, %cst_11 [1] : vector<8x128xf32> to vector<8xf32>
    %18 = vector.shape_cast %17 : vector<8xf32> to vector<8x1xf32>
    %19 = math.log %18 : vector<8x1xf32>
    %20 = vector.broadcast %19 : vector<8x1xf32> to vector<8x128xf32>
    %21 = arith.subf %15, %20 : vector<8x128xf32>
    %c0_12 = arith.constant 0 : index
    %c0_13 = arith.constant 0 : index
    %22 = vector.load %arg6[%c0_12, %c0_13] : memref<8x128xf32, #tpu.memory_space<vmem>>, vector<8x128xf32>
    tpu.vector_store %arg6[%c0_12, %c0_13], %21 {strides = array<i32>} : memref<8x128xf32, #tpu.memory_space<vmem>>, vector<8x128xf32>,
    return
  }
  func.func @transform_0(%arg0: i32) -> (i32, i32) {
    %c0_i32 = arith.constant 0 : i32
    %c0_i32_0 = arith.constant 0 : i32
    return %arg0, %c0_i32 : i32, i32
  }
  func.func @transform_1(%arg0: i32) -> (i32, i32) {
    %c0_i32 = arith.constant 0 : i32
    %c0_i32_0 = arith.constant 0 : i32
    %c0_i32_1 = arith.constant 0 : i32
    return %c0_i32, %c0_i32_0 : i32, i32
  }
  func.func @transform_2(%arg0: i32) -> (i32, i32) {
    %c0_i32 = arith.constant 0 : i32
    %c0_i32_0 = arith.constant 0 : i32
    %c0_i32_1 = arith.constant 0 : i32
    return %c0_i32, %c0_i32_0 : i32, i32
  }
  func.func @transform_3(%arg0: i32) -> (i32, i32) {
    %c0_i32 = arith.constant 0 : i32
    %c0_i32_0 = arith.constant 0 : i32
    %c0_i32_1 = arith.constant 0 : i32
    return %c0_i32, %c0_i32_0 : i32, i32
  }
  func.func @transform_4(%arg0: i32) -> (i32, i32) {
    %c0_i32 = arith.constant 0 : i32
    %c0_i32_0 = arith.constant 0 : i32
    %c0_i32_1 = arith.constant 0 : i32
    return %c0_i32, %c0_i32_0 : i32, i32
  }
  func.func @transform_5(%arg0: i32) -> (i32, i32) {
    %c0_i32 = arith.constant 0 : i32
    %c0_i32_0 = arith.constant 0 : i32
    return %arg0, %c0_i32 : i32, i32
  }
}

</mosaic_0001>

<bundles_post_ra>
// kernel: tpu_custom_call.1
= control target key start
LH: loop header
LB: loop body
LE: loop exit
PB: predicated region body
PF: predicated region fallthrough
CT: control target
= control target key end

     0   :  { %10 = vsyncpa [#allocation3], 0  ;;  %s653_s0 = inlined_call_operand.hbm [shape: f32[8,128], index: 0, kind: input, shape index: {}]   ;;  %s654_s1 = inlined_call_operand.hbm [shape: f32[128,128], index: 1, kind: input, shape index: {}]   ;;  %s655_s2 = inlined_call_operand.vmem [shape: f32[1,128], index: 2, kind: input, shape index: {}]   ;;  %s656_s3 = inlined_call_operand.hbm [shape: f32[128,128], index: 3, kind: input, shape index: {}]   ;;  %s657_s4 = inlined_call_operand.vmem [shape: f32[1,128], index: 4, kind: input, shape index: {}]   ;;  %s658_s5 = inlined_call_operand.hbm [shape: f32[8,128], index: 5, kind: output, shape index: {}]  }
   0x1   :  { %11 = vsyncpa [#allocation6], 0 }
   0x2   :  { %12 = vsyncpa [#allocation4], 0  ;;  %s538_s18 = smov [#allocation5]   ;;  %s444_s22 = scalar_lea.hbm %s654_s1, 2048 }
   0x3   :  { %s28_s19 = sshll.u32 %s538_s18, 4  ;;  %p445_p0 = scmp.ne.s32.totalorder %s654_s1, %s444_s22  ;;  %s29_s19 = int_to_ptr.vmem [resolvable:$true] %s28_s19 }
   0x4   :  { %p448_p1 = scmp.lt.u32.totalorder %s444_s22, %s654_s1 }
   0x6   :  { %p450_p2 = pnand %p448_p1, %p445_p0 }
   0x8   :  { %453 = shalt.err (!%p450_p2)
}
   0x9   :  { %s454_s27 = scalar_lea.vmem %s29_s19, 2048  ;;  %p459_p4 = scmp.lt.s32.totalorder %s29_s19, %s29_s19 }
   0xa   :  { %p455_p3 = scmp.ne.s32.totalorder %s29_s19, %s454_s27  ;;  %p460_p5 = scmp.lt.s32.totalorder %s454_s27, %s454_s27 }
   0xc   :  { %p461_p6 = por %p460_p5, %p459_p4 }
   0xe   :  { %p462_p7 = pnand %p461_p6, %p455_p3 }
  0x10   :  { %465 = shalt.err (!%p462_p7)
}
  0x11   :  { %s539_s28 = smov 128   ;;  %s540_s29 = smov 8  }
  0x12   :  { %34 = dma.hbm_to_vmem [thread:$0]  %s654_s1, 2048, %s29_s19, [#allocation6], %s539_s28, %s539_s28, %s540_s29  }
  0x13   :  { %s541_s7 = smov [#allocation2]   ;;  %s542_s9 = smov [#allocation7]  }
  0x14   :  { %s19_s8 = sshll.u32 %s541_s7, 4  ;;  %s42_s10 = sshll.u32 %s542_s9, 4  ;;  %s20_s8 = int_to_ptr.vmem [resolvable:$true] %s19_s8  ;;  %s43_s10 = int_to_ptr.vmem [resolvable:$true] %s42_s10 }
  0x15   :  { %s466_s13 = scalar_lea.hbm %s653_s0, 128 }
  0x16   :  { %p467_p8 = scmp.ne.s32.totalorder %s653_s0, %s466_s13  ;;  %p470_p9 = scmp.lt.u32.totalorder %s466_s13, %s653_s0 }
  0x18   :  { %p472_p10 = pnand %p470_p9, %p467_p8 }
  0x1a   :  { %475 = shalt.err (!%p472_p10)
}
  0x1b   :  { %s476_s1 = scalar_lea.vmem %s20_s8, 128  ;;  %p481_p12 = scmp.lt.s32.totalorder %s20_s8, %s20_s8 }
  0x1c   :  { %p477_p11 = scmp.ne.s32.totalorder %s20_s8, %s476_s1  ;;  %p482_p13 = scmp.lt.s32.totalorder %s476_s1, %s476_s1 }
  0x1e   :  { %p483_p0 = por %p482_p13, %p481_p12 }
  0x20   :  { %p484_p1 = pnand %p483_p0, %p477_p11 }
  0x22   :  { %487 = shalt.err (!%p484_p1)
}
  0x23   :  { %22 = dma.hbm_to_vmem [thread:$0]  %s653_s0, 128, %s20_s8, [#allocation3]  }
  0x24   :  { %s488_s22 = scalar_lea.hbm %s656_s3, 2048 }
  0x25   :  { %p489_p2 = scmp.ne.s32.totalorder %s656_s3, %s488_s22  ;;  %p492_p3 = scmp.lt.u32.totalorder %s488_s22, %s656_s3 }
  0x27   :  { %p494_p4 = pnand %p492_p3, %p489_p2 }
  0x29   :  { %497 = shalt.err (!%p494_p4)
}
  0x2a   :  { %s498_s27 = scalar_lea.vmem %s43_s10, 2048  ;;  %p503_p6 = scmp.lt.s32.totalorder %s43_s10, %s43_s10 }
  0x2b   :  { %p499_p5 = scmp.ne.s32.totalorder %s43_s10, %s498_s27  ;;  %p504_p7 = scmp.lt.s32.totalorder %s498_s27, %s498_s27 }
  0x2d   :  { %p505_p8 = por %p504_p7, %p503_p6 }
  0x2f   :  { %p506_p9 = pnand %p505_p8, %p499_p5 }
  0x31   :  { %509 = shalt.err (!%p506_p9)
}
  0x32   :  { %48 = dma.hbm_to_vmem [thread:$0]  %s656_s3, 2048, %s43_s10, [#allocation6], %s539_s28, %s539_s28, %s540_s29  }
  0x33   :  { %532 = dma.done.wait [#allocation3], 128  }
  0x34   :  { %533 = vsyncadd [#allocation3], 4294967168 }
  0x35   :  { %534 = dma.done.wait [#allocation6], 4096  }
  0x36   :  { %535 = vsyncadd [#allocation6], 4294963200  ;;  %v543_v0 = vmov 0.0|0.0   ;;  %vm544_vm0 = vmmov 0   ;;  %v545_v1 = vmov 0.0   ;;  %v61_v2 = vld [vmem:[#allocation5] sm:$0xff] }
  0x37   :  { %381 = vmatprep.subr.bf16.mxu0 %v543_v0  ;;  %343 = vmatprep.mubr.msk.f32.mxu0 %vm544_vm0, %v545_v1  ;;  %v62_v3 = vld [vmem:[#allocation5 + $0x8] sm:$0xff]  ;;  %v63_v4 = vld [vmem:[#allocation5 + $0x10] sm:$0xff]  ;;  %v64_v6 = vld [vmem:[#allocation5 + $0x18] sm:$0xff] }
  0x38   :  { %405 = vmatprep.subr.bf16.mxu1 %v543_v0  ;;  %378 = vmatprep.mubr.msk.f32.mxu1 %vm544_vm0, %v545_v1  ;;  %v382_v5 = vpack.c.bf16 %v62_v3, %v61_v2  ;;  %v385_v7 = vpack.c.bf16 %v64_v6, %v63_v4  ;;  %v65_v8 = vld [vmem:[#allocation5 + $0x20] sm:$0xff]  ;;  %v66_v9 = vld [vmem:[#allocation5 + $0x28] sm:$0xff]  ;;  %v157_v12 = vld [vmem:[#allocation7 + $0x10] sm:$0xff] }
  0x39   :  { %v155_v10 = vld [vmem:[#allocation7] sm:$0xff]  ;;  %v156_v11 = vld [vmem:[#allocation7 + $0x8] sm:$0xff]  ;;  %v158_v13 = vld [vmem:[#allocation7 + $0x18] sm:$0xff]  ;;  %v388_v14 = vpack.c.bf16 %v66_v9, %v65_v8 }
  0x3a   :  { %383 = vmatpush3.bf16.msra.mxu0 %v382_v5  ;;  %v406_v15 = vpack.c.bf16 %v156_v11, %v155_v10  ;;  %v67_v16 = vld [vmem:[#allocation5 + $0x30] sm:$0xff]  ;;  %v68_v17 = vld [vmem:[#allocation5 + $0x38] sm:$0xff]  ;;  %v409_v18 = vpack.c.bf16 %v158_v13, %v157_v12  ;;  %v159_v19 = vld [vmem:[#allocation7 + $0x20] sm:$0xff] }
  0x3b   :  { %384 = vmatprep.subr.bf16.mxu0 %v543_v0  ;;  %v160_v20 = vld [vmem:[#allocation7 + $0x28] sm:$0xff]  ;;  %v391_v21 = vpack.c.bf16 %v68_v17, %v67_v16  ;;  %v69_v22 = vld [vmem:[#allocation5 + $0x40] sm:$0xff]  ;;  %v161_v25 = vld [vmem:[#allocation7 + $0x30] sm:$0xff] }
  0x3c   :  { %407 = vmatpush3.bf16.msra.mxu1 %v406_v15  ;;  %v70_v23 = vld [vmem:[#allocation5 + $0x48] sm:$0xff]  ;;  %v412_v24 = vpack.c.bf16 %v160_v20, %v159_v19  ;;  %v162_v26 = vld [vmem:[#allocation7 + $0x38] sm:$0xff]  ;;  %v71_v28 = vld [vmem:[#allocation5 + $0x50] sm:$0xff] }
  0x3d   :  { %408 = vmatprep.subr.bf16.mxu1 %v543_v0  ;;  %v394_v27 = vpack.c.bf16 %v70_v23, %v69_v22  ;;  %v72_v29 = vld [vmem:[#allocation5 + $0x58] sm:$0xff]  ;;  %v415_v30 = vpack.c.bf16 %v162_v26, %v161_v25  ;;  %v163_v31 = vld [vmem:[#allocation7 + $0x40] sm:$0xff]  ;;  %v164_v32 = vld [vmem:[#allocation7 + $0x48] sm:$0xff] }
  0x3e   :  { %386 = vmatpush3.bf16.msra.mxu0 %v385_v7  ;;  %v397_v33 = vpack.c.bf16 %v72_v29, %v71_v28  ;;  %v73_v34 = vld [vmem:[#allocation5 + $0x60] sm:$0xff]  ;;  %v74_v35 = vld [vmem:[#allocation5 + $0x68] sm:$0xff]  ;;  %v418_v36 = vpack.c.bf16 %v164_v32, %v163_v31  ;;  %v75_v38 = vld [vmem:[#allocation5 + $0x70] sm:$0xff] }
  0x3f   :  { %387 = vmatprep.subr.bf16.mxu0 %v543_v0  ;;  %v400_v37 = vpack.c.bf16 %v74_v35, %v73_v34  ;;  %v76_v39 = vld [vmem:[#allocation5 + $0x78] sm:$0xff]  ;;  %v165_v42 = vld [vmem:[#allocation7 + $0x50] sm:$0xff]  ;;  %v167_v45 = vld [vmem:[#allocation7 + $0x60] sm:$0xff] }
  0x40   :  { %410 = vmatpush3.bf16.msra.mxu1 %v409_v18  ;;  %v403_v40 = vpack.c.bf16 %v76_v39, %v75_v38  ;;  %v60_v41 = vld [vmem:[#allocation2] sm:$0xff]  ;;  %v168_v46 = vld [vmem:[#allocation7 + $0x68] sm:$0xff]  ;;  %v169_v48 = vld [vmem:[#allocation7 + $0x70] sm:$0xff] }
  0x41   :  { %411 = vmatprep.subr.bf16.mxu1 %v543_v0  ;;  %v166_v43 = vld [vmem:[#allocation7 + $0x58] sm:$0xff]  ;;  %v424_v47 = vpack.c.bf16 %v168_v46, %v167_v45 }
  0x42   :  { %389 = vmatpush3.bf16.msra.mxu0 %v388_v14  ;;  %v421_v44 = vpack.c.bf16 %v166_v43, %v165_v42  ;;  %v170_v49 = vld [vmem:[#allocation7 + $0x78] sm:$0xff] }
  0x43   :  { %390 = vmatprep.subr.bf16.mxu0 %v543_v0  ;;  %v427_v50 = vpack.c.bf16 %v170_v49, %v169_v48  ;;  %v275_v51 = vld [vmem:[%s655_s2] ss:$0 sm:$0xff]  ;;  %s546_s2 = smov [#allocation8]  }
  0x44   :  { %413 = vmatpush3.bf16.msra.mxu1 %v412_v24  ;;  %v276_v56 = vld [vmem:[%s657_s4] ss:$0 sm:$0xff]  ;;  %s265_s7 = sshll.u32 %s546_s2, 4  ;;  %s266_s7 = int_to_ptr.vmem [resolvable:$true] %s265_s7 }
  0x45   :  { %414 = vmatprep.subr.bf16.mxu1 %v543_v0  ;;  %s510_s4 = scalar_lea.vmem %s266_s7, 128  ;;  %p515_p11 = scmp.lt.s32.totalorder %s266_s7, %s266_s7 }
  0x46   :  { %392 = vmatpush3.bf16.msra.mxu0 %v391_v21  ;;  %p511_p10 = scmp.ne.s32.totalorder %s266_s7, %s510_s4  ;;  %p516_p12 = scmp.lt.s32.totalorder %s510_s4, %s510_s4 }
  0x47   :  { %393 = vmatprep.subr.bf16.mxu0 %v543_v0 }
  0x48   :  { %416 = vmatpush3.bf16.msra.mxu1 %v415_v30  ;;  %p517_p13 = por %p516_p12, %p515_p11 }
  0x49   :  { %417 = vmatprep.subr.bf16.mxu1 %v543_v0 }
  0x4a   :  { %395 = vmatpush3.bf16.msra.mxu0 %v394_v27  ;;  %p518_p0 = pnand %p517_p13, %p511_p10 }
  0x4b   :  { %396 = vmatprep.subr.bf16.mxu0 %v543_v0 }
  0x4c   :  { %419 = vmatpush3.bf16.msra.mxu1 %v418_v36 }
  0x4d   :  { %420 = vmatprep.subr.bf16.mxu1 %v543_v0 }
  0x4e   :  { %398 = vmatpush3.bf16.msra.mxu0 %v397_v33 }
  0x4f   :  { %399 = vmatprep.subr.bf16.mxu0 %v543_v0 }
  0x50   :  { %422 = vmatpush3.bf16.msra.mxu1 %v421_v44 }
  0x51   :  { %423 = vmatprep.subr.bf16.mxu1 %v543_v0 }
  0x52   :  { %401 = vmatpush3.bf16.msra.mxu0 %v400_v37 }
  0x53   :  { %402 = vmatprep.subr.bf16.mxu0 %v543_v0 }
  0x54   :  { %425 = vmatpush3.bf16.msra.mxu1 %v424_v47 }
  0x55   :  { %426 = vmatprep.subr.bf16.mxu1 %v543_v0 }
  0x56   :  { %404 = vmatpush3.bf16.msra.mxu0 %v403_v40 }
  0x58   :  { %428 = vmatpush3.bf16.msra.mxu1 %v427_v50 }
  0x59   :  { %344 = vmatmul.mubr.f32.vlgmr.msra.gmra.mrb[0].mxu0 %v60_v41 }
 0x12c   :  { %v150_v52 = vpop.f32.mrb[0].mxu0 }
 0x12d   :  { %v151_v53 = vadd.f32 %v275_v51, %v150_v52  ;;  %v345_v54 = vpop.f32.mrb[1].mxu0 }
 0x12f   :  { %438 = vtanh.f32 %v151_v53 }
 0x139   :  { %v439_v55 = vpop.eup %438 }
 0x13a   :  { %379 = vmatmul.mubr.f32.vlgmr.msra.gmra.mrb[0].mxu1 %v439_v55 }
 0x20d   :  { %v244_v57 = vpop.f32.mrb[0].mxu1 }
 0x20e   :  { %v245_v58 = vadd.f32 %v276_v56, %v244_v57  ;;  %v380_v59 = vpop.f32.mrb[1].mxu1 }
 0x210   :  { %248 = vmax.xlane.f32.xlu0 %v245_v58 }
 0x29d   :  { %v249_v60 = vpop.xlane.xlu0 %248 }
 0x29e   :  { %v250_v61 = vsub.f32 %v245_v58, %v249_v60 }
 0x2a0   :  { %v251_v62 = vmul.f32 1.442695, %v250_v61 }
 0x2a2   :  { %440 = vpow2.f32 %v251_v62 }
 0x2ac   :  { %v441_v63 = vpop.eup %440 }
 0x2ad   :  { %253 = vadd.xlane.f32.xlu0 %v441_v63 }
 0x33a   :  { %v254_v0 = vpop.xlane.xlu0 %253 }
 0x33b   :  { %442 = vlog2.f32 %v254_v0 }
 0x345   :  { %v443_v1 = vpop.eup %442 }
 0x346   :  { %v256_v2 = vmul.f32 0.6931472, %v443_v1 }
 0x348   :  { %v257_v3 = vsub.f32 %v250_v61, %v256_v2 }
 0x34a   :  { %258 = vst [vmem:[#allocation8] sm:$0xff] %v257_v3 }
 0x34b   :  { %521 = shalt.err (!%p518_p0)
}
 0x34c   :  { %s522_s10 = scalar_lea.hbm %s658_s5, 128 }
 0x34d   :  { %p523_p1 = scmp.ne.s32.totalorder %s658_s5, %s522_s10  ;;  %p526_p2 = scmp.lt.u32.totalorder %s522_s10, %s658_s5 }
 0x34f   :  { %p528_p3 = pnand %p526_p2, %p523_p1 }
 0x351   :  { %531 = shalt.err (!%p528_p3)
}
 0x352   :  { %268 = dma.vmem_to_hbm [thread:$0]  %s266_s7, 128, %s658_s5, [#allocation4]  }
 0x353   :  { %536 = dma.done.wait [#allocation4], 128  }
 0x354   :  { %537 = vsyncadd [#allocation4], 4294967168 }
 0x355   :  { %272 = vsyncpa [#allocation3], 1 }
 0x356   :  { %273 = vsyncpa [#allocation6], 1 }
 0x357   :  { %274 = vsyncpa [#allocation4], 1 }

</bundles_post_ra>
